<compile_context>
chip_gen: v6e
topology: v6e:2x2x1
jax: 0.10.0
libtpu: 0.0.40
codegen_flags: <defaults>
</compile_context>

<pallas_src>
import functools
import math

import jax
import jax.numpy as jnp
from jax import lax
from jax.experimental import pallas as pl
from jax.experimental.pallas import tpu as pltpu


def _round_up(x, m):
    return ((x + m - 1) // m) * m


def _horn_kernel(pre_ref, wh_ref, wo_ref, bo_ref, out_ref, x_sc, y_sc, *,
                 tt, h, alpha, omega_factor, gamma_factor):
    # grid = (batch_tiles [parallel], time_blocks [arbitrary, innermost])
    tb = pl.program_id(1)

    # x_0 = y_0 = 0 at the start of every batch tile (random_init=None path).
    @pl.when(tb == 0)
    def _():
        x_sc[...] = jnp.zeros_like(x_sc)
        y_sc[...] = jnp.zeros_like(y_sc)

    wh = wh_ref[...]          # (Np, Np), already scaled by gain_rec

    def step(i, carry):
        x_t, y_t = carry
        # pre = i2h(input_t) + bi + gain_rec*bh, precomputed in the wrapper.
        pre = pre_ref[i]      # (TB, Np)
        drive = jnp.tanh(
            pre + jnp.dot(y_t.astype(wh.dtype), wh,
                          preferred_element_type=jnp.float32))
        y_new = y_t + h * (alpha * drive - omega_factor * x_t - gamma_factor * y_t)
        x_new = x_t + h * y_new
        return (x_new, y_new)

    x_t, y_t = lax.fori_loop(0, tt, step, (x_sc[...], y_sc[...]), unroll=True)
    x_sc[...] = x_t
    y_sc[...] = y_t

    # Fused readout: output = h2o(x_T), written on the last time block.
    @pl.when(tb == pl.num_programs(1) - 1)
    def _():
        out = jnp.dot(x_t, wo_ref[...], preferred_element_type=jnp.float32) + bo_ref[...]
        out_ref[...] = out.astype(out_ref.dtype)


def horn_forward(batch, params, *, h, alpha, omega, gamma,
                 h2h_dtype=jnp.float32):
    """batch: (T, B, num_input) float32. Returns output (B, num_output) float32.

    Weights are passed PRE-TRANSPOSED ((in, out)); biases as (1, out).
    Set h2h_dtype=jnp.bfloat16 on v6e/v7x for a faster/lighter h2h matmul
    (f32 accumulation is kept; validate drift for long T).
    """
    T, B, num_input = batch.shape
    wi, bi, wh, bh, wo, bo = params
    num_nodes = wi.shape[1]
    num_output = wo.shape[1]

    omega_factor = omega * omega
    gamma_factor = 2.0 * gamma
    gain_rec = 1.0 / math.sqrt(num_nodes)

    # ---- hoist the input projection out of the recurrence (one big matmul) ----
    # pre[t] = i2h(batch[t]) + gain_rec * bh   (h2h bias folded in as well)
    pre = jnp.einsum('tbi,io->tbo', batch.astype(jnp.float32), wi) + (bi + gain_rec * bh)

    # ---- pad to vreg / MXU friendly shapes ----
    TB = min(128, _round_up(B, 8))       # per-core batch tile (sublane multiple)
    Bp = _round_up(B, TB)
    Np = _round_up(num_nodes, 128)
    Op = _round_up(num_output, 128)      # lane-dense output store (no vst.msk)

    # Time block that divides T exactly (padded timesteps would alter the dynamics).
    TT = next(c for c in (32, 16, 8, 4, 2, 1) if T % c == 0)

    pre_p = jnp.zeros((T, Bp, Np), jnp.float32).at[:, :B, :num_nodes].set(pre)
    wh_p = jnp.zeros((Np, Np), jnp.float32).at[:num_nodes, :num_nodes].set(gain_rec * wh)
    wh_p = wh_p.astype(h2h_dtype)
    wo_p = jnp.zeros((Np, Op), jnp.float32).at[:num_nodes, :num_output].set(wo)
    bo_p = jnp.zeros((1, Op), jnp.float32).at[:, :num_output].set(bo)

    kernel = functools.partial(
        _horn_kernel, tt=TT, h=h, alpha=alpha,
        omega_factor=omega_factor, gamma_factor=gamma_factor)

    # Whole-array VMEM residency: no per-step re-DMA, no double-buffering of weights.
    vmem_res = pl.BlockSpec(memory_space=pltpu.MemorySpace.VMEM)

    # Rough VMEM footprint -> explicit scoped limit (re-derived for v7x's 64 MiB/TC).
    est = (2 * TT * TB * Np * 4                              # pre block (double-buffered)
           + Np * Np * jnp.dtype(h2h_dtype).itemsize         # wh (resident)
           + Np * Op * 4 + Op * 4                            # wo, bo (resident)
           + 2 * TB * Op * 4                                 # output block
           + 2 * TB * Np * 4)                                # x/y state scratch
    vmem_limit = int(min(64 * 1024 * 1024, max(32 * 1024 * 1024, 2 * est)))

    out = pl.pallas_call(
        kernel,
        out_shape=jax.ShapeDtypeStruct((Bp, Op), jnp.float32),
        grid_spec=pltpu.PrefetchScalarGridSpec(
            num_scalar_prefetch=0,
            grid=(Bp // TB, T // TT),
            in_specs=[
                pl.BlockSpec((TT, TB, Np), lambda b, t: (t, b, 0)),  # precomputed drive
                vmem_res,                                            # wh (gain_rec folded)
                vmem_res,                                            # wo
                vmem_res,                                            # bo
            ],
            out_specs=pl.BlockSpec((TB, Op), lambda b, t: (b, 0)),   # resident across t
            scratch_shapes=[
                pltpu.VMEM((TB, Np), jnp.float32),   # x_t
                pltpu.VMEM((TB, Np), jnp.float32),   # y_t
            ],
        ),
        compiler_params=pltpu.CompilerParams(
            dimension_semantics=("parallel", "arbitrary"),  # batch || , time sequential
            vmem_limit_bytes=vmem_limit),
    )(pre_p, wh_p, wo_p, bo_p)

    return out[:B, :num_output]


def horn_reference(batch, params, *, h, alpha, omega, gamma):
    """Pure-JAX reference mirroring the PyTorch loop (for correctness check)."""
    wi, bi, wh, bh, wo, bo = params
    num_nodes = wi.shape[1]
    omega_factor = omega * omega
    gamma_factor = 2.0 * gamma
    gain_rec = 1.0 / math.sqrt(num_nodes)
    B = batch.shape[1]

    def step(carry, inp):
        x_t, y_t = carry
        drive = jnp.tanh(inp @ wi + bi + gain_rec * (y_t @ wh + bh))
        y_t = y_t + h * (alpha * drive - omega_factor * x_t - gamma_factor * y_t)
        x_t = x_t + h * y_t
        return (x_t, y_t), None

    x0 = jnp.zeros((B, num_nodes), jnp.float32)
    y0 = jnp.zeros((B, num_nodes), jnp.float32)
    (x_T, _), _ = jax.lax.scan(step, (x0, y0), batch)
    return x_T @ wo + bo


if __name__ == "__main__":
    # Small, deterministic setup consistent with the PyTorch module.
    T, B = 8, 2
    num_input, num_nodes, num_output = 4, 32, 3
    h, alpha, omega, gamma = 0.1, 1.0, 1.0, 0.1

    key = jax.random.PRNGKey(0)
    ks = jax.random.split(key, 7)

    # Deterministic "Linear" parameters (stored transposed: (in, out)); biases (1, out).
    def init_linear(kw, kb, fan_in, fan_out):
        bound = 1.0 / math.sqrt(fan_in)
        w = jax.random.uniform(kw, (fan_in, fan_out), jnp.float32, -bound, bound)
        b = jax.random.uniform(kb, (1, fan_out), jnp.float32, -bound, bound)
        return w, b

    wi, bi = init_linear(ks[0], ks[1], num_input, num_nodes)
    wh, bh = init_linear(ks[2], ks[3], num_nodes, num_nodes)
    wo, bo = init_linear(ks[4], ks[5], num_nodes, num_output)
    params = (wi, bi, wh, bh, wo, bo)

    batch = jax.random.normal(ks[6], (T, B, num_input), jnp.float32)

    out = horn_forward(batch, params, h=h, alpha=alpha, omega=omega, gamma=gamma)
    out = jax.block_until_ready(out)

    ref = horn_reference(batch, params, h=h, alpha=alpha, omega=omega, gamma=gamma)
    assert out.shape == (B, num_output)
    assert jnp.allclose(out, ref, atol=1e-4, rtol=1e-4), (out, ref)

    # TODO(synk): `record=True` (per-timestep x_t/y_t traces) and `random_init`
    # state init are not implemented; only the default forward (output = h2o(x_T)).
    print("KERNEL_OK")
</pallas_src>

<mosaic_0001>
module attributes {stable_mosaic.version = 11 : i64} {
  func.func @_horn_kernel(%arg0: i32, %arg1: i32, %arg2: memref<8x8x128xf32, #tpu.memory_space<vmem>>, %arg3: memref<128x128xf32, #tpu.memory_space<vmem>>, %arg4: memref<128x128xf32, #tpu.memory_space<vmem>>, %arg5: memref<1x128xf32, #tpu.memory_space<vmem>>, %arg6: memref<8x128xf32, #tpu.memory_space<vmem>>, %arg7: memref<8x128xf32, #tpu.memory_space<vmem>>, %arg8: memref<8x128xf32, #tpu.memory_space<vmem>>) attributes {dimension_semantics = [#tpu.dimension_semantics<parallel>, #tpu.dimension_semantics<arbitrary>], iteration_bounds = array<i64: 1, 1>, scalar_prefetch = 0 : i64, scratch_operands = 2 : i64, tpu.core_type = #tpu.core_type<tc>, window_params = [{transform_indices = @transform_0, window_bounds = array<i64: 8, 8, 128>}, {pipeline_mode = #tpu.pipeline_mode<synchronous>, transform_indices = @transform_1, window_bounds = array<i64: 128, 128>}, {pipeline_mode = #tpu.pipeline_mode<synchronous>, transform_indices = @transform_2, window_bounds = array<i64: 128, 128>}, {pipeline_mode = #tpu.pipeline_mode<synchronous>, transform_indices = @transform_3, window_bounds = array<i64: 1, 128>}, {transform_indices = @transform_4, window_bounds = array<i64: 8, 128>}]} {
    %c0_i32 = arith.constant 0 : i32
    %0 = arith.cmpi eq, %arg1, %c0_i32 : i32
    %1 = arith.extui %0 : i1 to i32
    %c0_i32_0 = arith.constant 0 : i32
    %2 = arith.cmpi ne, %1, %c0_i32_0 : i32
    scf.if %2 {
      %cst_76 = arith.constant 0.000000e+00 : f32
      %171 = vector.broadcast %cst_76 : f32 to vector<8x128xf32>
      %c0_77 = arith.constant 0 : index
      %c0_78 = arith.constant 0 : index
      %172 = vector.load %arg7[%c0_77, %c0_78] : memref<8x128xf32, #tpu.memory_space<vmem>>, vector<8x128xf32>
      tpu.vector_store %arg7[%c0_77, %c0_78], %171 {strides = array<i32>} : memref<8x128xf32, #tpu.memory_space<vmem>>, vector<8x128xf32>,
      %cst_79 = arith.constant 0.000000e+00 : f32
      %173 = vector.broadcast %cst_79 : f32 to vector<8x128xf32>
      %c0_80 = arith.constant 0 : index
      %c0_81 = arith.constant 0 : index
      %174 = vector.load %arg8[%c0_80, %c0_81] : memref<8x128xf32, #tpu.memory_space<vmem>>, vector<8x128xf32>
      tpu.vector_store %arg8[%c0_80, %c0_81], %173 {strides = array<i32>} : memref<8x128xf32, #tpu.memory_space<vmem>>, vector<8x128xf32>,
    } else {
    }
    %c0 = arith.constant 0 : index
    %c0_1 = arith.constant 0 : index
    %3 = vector.load %arg3[%c0, %c0_1] : memref<128x128xf32, #tpu.memory_space<vmem>>, vector<128x128xf32>
    %c0_2 = arith.constant 0 : index
    %c0_3 = arith.constant 0 : index
    %4 = vector.load %arg7[%c0_2, %c0_3] : memref<8x128xf32, #tpu.memory_space<vmem>>, vector<8x128xf32>
    %c0_4 = arith.constant 0 : index
    %c0_5 = arith.constant 0 : index
    %5 = vector.load %arg8[%c0_4, %c0_5] : memref<8x128xf32, #tpu.memory_space<vmem>>, vector<8x128xf32>
    %c0_i32_6 = arith.constant 0 : i32
    %6 = arith.index_cast %c0_i32_6 : i32 to index
    %c0_7 = arith.constant 0 : index
    %c0_8 = arith.constant 0 : index
    %7 = vector.load %arg2[%6, %c0_7, %c0_8] : memref<8x8x128xf32, #tpu.memory_space<vmem>>, vector<1x8x128xf32>
    %8 = vector.shape_cast %7 : vector<1x8x128xf32> to vector<8x128xf32>
    %cst = arith.constant dense<0.000000e+00> : vector<8x128xf32>
    %9 = tpu.matmul %5, %3, %cst {dimension_numbers = #tpu.dot_dimension_numbers<[1], [0], [0], [1], [0, 0, 1, 1], [], []>} : vector<8x128xf32>, vector<128x128xf32>, vector<8x128xf32> -> vector<8x128xf32>
    %10 = arith.addf %8, %9 : vector<8x128xf32>
    %11 = math.tanh %10 : vector<8x128xf32>
    %cst_9 = arith.constant 1.000000e+00 : f32
    %12 = vector.broadcast %cst_9 : f32 to vector<8x128xf32>
    %13 = arith.mulf %12, %11 : vector<8x128xf32>
    %cst_10 = arith.constant 1.000000e+00 : f32
    %14 = vector.broadcast %cst_10 : f32 to vector<8x128xf32>
    %15 = arith.mulf %14, %4 : vector<8x128xf32>
    %16 = arith.subf %13, %15 : vector<8x128xf32>
    %cst_11 = arith.constant 2.000000e-01 : f32
    %17 = vector.broadcast %cst_11 : f32 to vector<8x128xf32>
    %18 = arith.mulf %17, %5 : vector<8x128xf32>
    %19 = arith.subf %16, %18 : vector<8x128xf32>
    %cst_12 = arith.constant 1.000000e-01 : f32
    %20 = vector.broadcast %cst_12 : f32 to vector<8x128xf32>
    %21 = arith.mulf %20, %19 : vector<8x128xf32>
    %22 = arith.addf %5, %21 : vector<8x128xf32>
    %cst_13 = arith.constant 1.000000e-01 : f32
    %23 = vector.broadcast %cst_13 : f32 to vector<8x128xf32>
    %24 = arith.mulf %23, %22 : vector<8x128xf32>
    %25 = arith.addf %4, %24 : vector<8x128xf32>
    %c1_i32 = arith.constant 1 : i32
    %26 = arith.index_cast %c1_i32 : i32 to index
    %c0_14 = arith.constant 0 : index
    %c0_15 = arith.constant 0 : index
    %27 = vector.load %arg2[%26, %c0_14, %c0_15] : memref<8x8x128xf32, #tpu.memory_space<vmem>>, vector<1x8x128xf32>
    %28 = vector.shape_cast %27 : vector<1x8x128xf32> to vector<8x128xf32>
    %cst_16 = arith.constant dense<0.000000e+00> : vector<8x128xf32>
    %29 = tpu.matmul %22, %3, %cst_16 {dimension_numbers = #tpu.dot_dimension_numbers<[1], [0], [0], [1], [0, 0, 1, 1], [], []>} : vector<8x128xf32>, vector<128x128xf32>, vector<8x128xf32> -> vector<8x128xf32>
    %30 = arith.addf %28, %29 : vector<8x128xf32>
    %31 = math.tanh %30 : vector<8x128xf32>
    %cst_17 = arith.constant 1.000000e+00 : f32
    %32 = vector.broadcast %cst_17 : f32 to vector<8x128xf32>
    %33 = arith.mulf %32, %31 : vector<8x128xf32>
    %cst_18 = arith.constant 1.000000e+00 : f32
    %34 = vector.broadcast %cst_18 : f32 to vector<8x128xf32>
    %35 = arith.mulf %34, %25 : vector<8x128xf32>
    %36 = arith.subf %33, %35 : vector<8x128xf32>
    %cst_19 = arith.constant 2.000000e-01 : f32
    %37 = vector.broadcast %cst_19 : f32 to vector<8x128xf32>
    %38 = arith.mulf %37, %22 : vector<8x128xf32>
    %39 = arith.subf %36, %38 : vector<8x128xf32>
    %cst_20 = arith.constant 1.000000e-01 : f32
    %40 = vector.broadcast %cst_20 : f32 to vector<8x128xf32>
    %41 = arith.mulf %40, %39 : vector<8x128xf32>
    %42 = arith.addf %22, %41 : vector<8x128xf32>
    %cst_21 = arith.constant 1.000000e-01 : f32
    %43 = vector.broadcast %cst_21 : f32 to vector<8x128xf32>
    %44 = arith.mulf %43, %42 : vector<8x128xf32>
    %45 = arith.addf %25, %44 : vector<8x128xf32>
    %c2_i32 = arith.constant 2 : i32
    %46 = arith.index_cast %c2_i32 : i32 to index
    %c0_22 = arith.constant 0 : index
    %c0_23 = arith.constant 0 : index
    %47 = vector.load %arg2[%46, %c0_22, %c0_23] : memref<8x8x128xf32, #tpu.memory_space<vmem>>, vector<1x8x128xf32>
    %48 = vector.shape_cast %47 : vector<1x8x128xf32> to vector<8x128xf32>
    %cst_24 = arith.constant dense<0.000000e+00> : vector<8x128xf32>
    %49 = tpu.matmul %42, %3, %cst_24 {dimension_numbers = #tpu.dot_dimension_numbers<[1], [0], [0], [1], [0, 0, 1, 1], [], []>} : vector<8x128xf32>, vector<128x128xf32>, vector<8x128xf32> -> vector<8x128xf32>
    %50 = arith.addf %48, %49 : vector<8x128xf32>
    %51 = math.tanh %50 : vector<8x128xf32>
    %cst_25 = arith.constant 1.000000e+00 : f32
    %52 = vector.broadcast %cst_25 : f32 to vector<8x128xf32>
    %53 = arith.mulf %52, %51 : vector<8x128xf32>
    %cst_26 = arith.constant 1.000000e+00 : f32
    %54 = vector.broadcast %cst_26 : f32 to vector<8x128xf32>
    %55 = arith.mulf %54, %45 : vector<8x128xf32>
    %56 = arith.subf %53, %55 : vector<8x128xf32>
    %cst_27 = arith.constant 2.000000e-01 : f32
    %57 = vector.broadcast %cst_27 : f32 to vector<8x128xf32>
    %58 = arith.mulf %57, %42 : vector<8x128xf32>
    %59 = arith.subf %56, %58 : vector<8x128xf32>
    %cst_28 = arith.constant 1.000000e-01 : f32
    %60 = vector.broadcast %cst_28 : f32 to vector<8x128xf32>
    %61 = arith.mulf %60, %59 : vector<8x128xf32>
    %62 = arith.addf %42, %61 : vector<8x128xf32>
    %cst_29 = arith.constant 1.000000e-01 : f32
    %63 = vector.broadcast %cst_29 : f32 to vector<8x128xf32>
    %64 = arith.mulf %63, %62 : vector<8x128xf32>
    %65 = arith.addf %45, %64 : vector<8x128xf32>
    %c3_i32 = arith.constant 3 : i32
    %66 = arith.index_cast %c3_i32 : i32 to index
    %c0_30 = arith.constant 0 : index
    %c0_31 = arith.constant 0 : index
    %67 = vector.load %arg2[%66, %c0_30, %c0_31] : memref<8x8x128xf32, #tpu.memory_space<vmem>>, vector<1x8x128xf32>
    %68 = vector.shape_cast %67 : vector<1x8x128xf32> to vector<8x128xf32>
    %cst_32 = arith.constant dense<0.000000e+00> : vector<8x128xf32>
    %69 = tpu.matmul %62, %3, %cst_32 {dimension_numbers = #tpu.dot_dimension_numbers<[1], [0], [0], [1], [0, 0, 1, 1], [], []>} : vector<8x128xf32>, vector<128x128xf32>, vector<8x128xf32> -> vector<8x128xf32>
    %70 = arith.addf %68, %69 : vector<8x128xf32>
    %71 = math.tanh %70 : vector<8x128xf32>
    %cst_33 = arith.constant 1.000000e+00 : f32
    %72 = vector.broadcast %cst_33 : f32 to vector<8x128xf32>
    %73 = arith.mulf %72, %71 : vector<8x128xf32>
    %cst_34 = arith.constant 1.000000e+00 : f32
    %74 = vector.broadcast %cst_34 : f32 to vector<8x128xf32>
    %75 = arith.mulf %74, %65 : vector<8x128xf32>
    %76 = arith.subf %73, %75 : vector<8x128xf32>
    %cst_35 = arith.constant 2.000000e-01 : f32
    %77 = vector.broadcast %cst_35 : f32 to vector<8x128xf32>
    %78 = arith.mulf %77, %62 : vector<8x128xf32>
    %79 = arith.subf %76, %78 : vector<8x128xf32>
    %cst_36 = arith.constant 1.000000e-01 : f32
    %80 = vector.broadcast %cst_36 : f32 to vector<8x128xf32>
    %81 = arith.mulf %80, %79 : vector<8x128xf32>
    %82 = arith.addf %62, %81 : vector<8x128xf32>
    %cst_37 = arith.constant 1.000000e-01 : f32
    %83 = vector.broadcast %cst_37 : f32 to vector<8x128xf32>
    %84 = arith.mulf %83, %82 : vector<8x128xf32>
    %85 = arith.addf %65, %84 : vector<8x128xf32>
    %c4_i32 = arith.constant 4 : i32
    %86 = arith.index_cast %c4_i32 : i32 to index
    %c0_38 = arith.constant 0 : index
    %c0_39 = arith.constant 0 : index
    %87 = vector.load %arg2[%86, %c0_38, %c0_39] : memref<8x8x128xf32, #tpu.memory_space<vmem>>, vector<1x8x128xf32>
    %88 = vector.shape_cast %87 : vector<1x8x128xf32> to vector<8x128xf32>
    %cst_40 = arith.constant dense<0.000000e+00> : vector<8x128xf32>
    %89 = tpu.matmul %82, %3, %cst_40 {dimension_numbers = #tpu.dot_dimension_numbers<[1], [0], [0], [1], [0, 0, 1, 1], [], []>} : vector<8x128xf32>, vector<128x128xf32>, vector<8x128xf32> -> vector<8x128xf32>
    %90 = arith.addf %88, %89 : vector<8x128xf32>
    %91 = math.tanh %90 : vector<8x128xf32>
    %cst_41 = arith.constant 1.000000e+00 : f32
    %92 = vector.broadcast %cst_41 : f32 to vector<8x128xf32>
    %93 = arith.mulf %92, %91 : vector<8x128xf32>
    %cst_42 = arith.constant 1.000000e+00 : f32
    %94 = vector.broadcast %cst_42 : f32 to vector<8x128xf32>
    %95 = arith.mulf %94, %85 : vector<8x128xf32>
    %96 = arith.subf %93, %95 : vector<8x128xf32>
    %cst_43 = arith.constant 2.000000e-01 : f32
    %97 = vector.broadcast %cst_43 : f32 to vector<8x128xf32>
    %98 = arith.mulf %97, %82 : vector<8x128xf32>
    %99 = arith.subf %96, %98 : vector<8x128xf32>
    %cst_44 = arith.constant 1.000000e-01 : f32
    %100 = vector.broadcast %cst_44 : f32 to vector<8x128xf32>
    %101 = arith.mulf %100, %99 : vector<8x128xf32>
    %102 = arith.addf %82, %101 : vector<8x128xf32>
    %cst_45 = arith.constant 1.000000e-01 : f32
    %103 = vector.broadcast %cst_45 : f32 to vector<8x128xf32>
    %104 = arith.mulf %103, %102 : vector<8x128xf32>
    %105 = arith.addf %85, %104 : vector<8x128xf32>
    %c5_i32 = arith.constant 5 : i32
    %106 = arith.index_cast %c5_i32 : i32 to index
    %c0_46 = arith.constant 0 : index
    %c0_47 = arith.constant 0 : index
    %107 = vector.load %arg2[%106, %c0_46, %c0_47] : memref<8x8x128xf32, #tpu.memory_space<vmem>>, vector<1x8x128xf32>
    %108 = vector.shape_cast %107 : vector<1x8x128xf32> to vector<8x128xf32>
    %cst_48 = arith.constant dense<0.000000e+00> : vector<8x128xf32>
    %109 = tpu.matmul %102, %3, %cst_48 {dimension_numbers = #tpu.dot_dimension_numbers<[1], [0], [0], [1], [0, 0, 1, 1], [], []>} : vector<8x128xf32>, vector<128x128xf32>, vector<8x128xf32> -> vector<8x128xf32>
    %110 = arith.addf %108, %109 : vector<8x128xf32>
    %111 = math.tanh %110 : vector<8x128xf32>
    %cst_49 = arith.constant 1.000000e+00 : f32
    %112 = vector.broadcast %cst_49 : f32 to vector<8x128xf32>
    %113 = arith.mulf %112, %111 : vector<8x128xf32>
    %cst_50 = arith.constant 1.000000e+00 : f32
    %114 = vector.broadcast %cst_50 : f32 to vector<8x128xf32>
    %115 = arith.mulf %114, %105 : vector<8x128xf32>
    %116 = arith.subf %113, %115 : vector<8x128xf32>
    %cst_51 = arith.constant 2.000000e-01 : f32
    %117 = vector.broadcast %cst_51 : f32 to vector<8x128xf32>
    %118 = arith.mulf %117, %102 : vector<8x128xf32>
    %119 = arith.subf %116, %118 : vector<8x128xf32>
    %cst_52 = arith.constant 1.000000e-01 : f32
    %120 = vector.broadcast %cst_52 : f32 to vector<8x128xf32>
    %121 = arith.mulf %120, %119 : vector<8x128xf32>
    %122 = arith.addf %102, %121 : vector<8x128xf32>
    %cst_53 = arith.constant 1.000000e-01 : f32
    %123 = vector.broadcast %cst_53 : f32 to vector<8x128xf32>
    %124 = arith.mulf %123, %122 : vector<8x128xf32>
    %125 = arith.addf %105, %124 : vector<8x128xf32>
    %c6_i32 = arith.constant 6 : i32
    %126 = arith.index_cast %c6_i32 : i32 to index
    %c0_54 = arith.constant 0 : index
    %c0_55 = arith.constant 0 : index
    %127 = vector.load %arg2[%126, %c0_54, %c0_55] : memref<8x8x128xf32, #tpu.memory_space<vmem>>, vector<1x8x128xf32>
    %128 = vector.shape_cast %127 : vector<1x8x128xf32> to vector<8x128xf32>
    %cst_56 = arith.constant dense<0.000000e+00> : vector<8x128xf32>
    %129 = tpu.matmul %122, %3, %cst_56 {dimension_numbers = #tpu.dot_dimension_numbers<[1], [0], [0], [1], [0, 0, 1, 1], [], []>} : vector<8x128xf32>, vector<128x128xf32>, vector<8x128xf32> -> vector<8x128xf32>
    %130 = arith.addf %128, %129 : vector<8x128xf32>
    %131 = math.tanh %130 : vector<8x128xf32>
    %cst_57 = arith.constant 1.000000e+00 : f32
    %132 = vector.broadcast %cst_57 : f32 to vector<8x128xf32>
    %133 = arith.mulf %132, %131 : vector<8x128xf32>
    %cst_58 = arith.constant 1.000000e+00 : f32
    %134 = vector.broadcast %cst_58 : f32 to vector<8x128xf32>
    %135 = arith.mulf %134, %125 : vector<8x128xf32>
    %136 = arith.subf %133, %135 : vector<8x128xf32>
    %cst_59 = arith.constant 2.000000e-01 : f32
    %137 = vector.broadcast %cst_59 : f32 to vector<8x128xf32>
    %138 = arith.mulf %137, %122 : vector<8x128xf32>
    %139 = arith.subf %136, %138 : vector<8x128xf32>
    %cst_60 = arith.constant 1.000000e-01 : f32
    %140 = vector.broadcast %cst_60 : f32 to vector<8x128xf32>
    %141 = arith.mulf %140, %139 : vector<8x128xf32>
    %142 = arith.addf %122, %141 : vector<8x128xf32>
    %cst_61 = arith.constant 1.000000e-01 : f32
    %143 = vector.broadcast %cst_61 : f32 to vector<8x128xf32>
    %144 = arith.mulf %143, %142 : vector<8x128xf32>
    %145 = arith.addf %125, %144 : vector<8x128xf32>
    %c7_i32 = arith.constant 7 : i32
    %146 = arith.index_cast %c7_i32 : i32 to index
    %c0_62 = arith.constant 0 : index
    %c0_63 = arith.constant 0 : index
    %147 = vector.load %arg2[%146, %c0_62, %c0_63] : memref<8x8x128xf32, #tpu.memory_space<vmem>>, vector<1x8x128xf32>
    %148 = vector.shape_cast %147 : vector<1x8x128xf32> to vector<8x128xf32>
    %cst_64 = arith.constant dense<0.000000e+00> : vector<8x128xf32>
    %149 = tpu.matmul %142, %3, %cst_64 {dimension_numbers = #tpu.dot_dimension_numbers<[1], [0], [0], [1], [0, 0, 1, 1], [], []>} : vector<8x128xf32>, vector<128x128xf32>, vector<8x128xf32> -> vector<8x128xf32>
    %150 = arith.addf %148, %149 : vector<8x128xf32>
    %151 = math.tanh %150 : vector<8x128xf32>
    %cst_65 = arith.constant 1.000000e+00 : f32
    %152 = vector.broadcast %cst_65 : f32 to vector<8x128xf32>
    %153 = arith.mulf %152, %151 : vector<8x128xf32>
    %cst_66 = arith.constant 1.000000e+00 : f32
    %154 = vector.broadcast %cst_66 : f32 to vector<8x128xf32>
    %155 = arith.mulf %154, %145 : vector<8x128xf32>
    %156 = arith.subf %153, %155 : vector<8x128xf32>
    %cst_67 = arith.constant 2.000000e-01 : f32
    %157 = vector.broadcast %cst_67 : f32 to vector<8x128xf32>
    %158 = arith.mulf %157, %142 : vector<8x128xf32>
    %159 = arith.subf %156, %158 : vector<8x128xf32>
    %cst_68 = arith.constant 1.000000e-01 : f32
    %160 = vector.broadcast %cst_68 : f32 to vector<8x128xf32>
    %161 = arith.mulf %160, %159 : vector<8x128xf32>
    %162 = arith.addf %142, %161 : vector<8x128xf32>
    %cst_69 = arith.constant 1.000000e-01 : f32
    %163 = vector.broadcast %cst_69 : f32 to vector<8x128xf32>
    %164 = arith.mulf %163, %162 : vector<8x128xf32>
    %165 = arith.addf %145, %164 : vector<8x128xf32>
    %c8_i32 = arith.constant 8 : i32
    %c0_70 = arith.constant 0 : index
    %c0_71 = arith.constant 0 : index
    %166 = vector.load %arg7[%c0_70, %c0_71] : memref<8x128xf32, #tpu.memory_space<vmem>>, vector<8x128xf32>
    tpu.vector_store %arg7[%c0_70, %c0_71], %165 {strides = array<i32>} : memref<8x128xf32, #tpu.memory_space<vmem>>, vector<8x128xf32>,
    %c0_72 = arith.constant 0 : index
    %c0_73 = arith.constant 0 : index
    %167 = vector.load %arg8[%c0_72, %c0_73] : memref<8x128xf32, #tpu.memory_space<vmem>>, vector<8x128xf32>
    tpu.vector_store %arg8[%c0_72, %c0_73], %162 {strides = array<i32>} : memref<8x128xf32, #tpu.memory_space<vmem>>, vector<8x128xf32>,
    %c0_i32_74 = arith.constant 0 : i32
    %168 = arith.cmpi eq, %arg1, %c0_i32_74 : i32
    %169 = arith.extui %168 : i1 to i32
    %c0_i32_75 = arith.constant 0 : i32
    %170 = arith.cmpi ne, %169, %c0_i32_75 : i32
    scf.if %170 {
      %c0_76 = arith.constant 0 : index
      %c0_77 = arith.constant 0 : index
      %171 = vector.load %arg4[%c0_76, %c0_77] : memref<128x128xf32, #tpu.memory_space<vmem>>, vector<128x128xf32>
      %cst_78 = arith.constant dense<0.000000e+00> : vector<8x128xf32>
      %172 = tpu.matmul %165, %171, %cst_78 {dimension_numbers = #tpu.dot_dimension_numbers<[1], [0], [0], [1], [0, 0, 1, 1], [], []>} : vector<8x128xf32>, vector<128x128xf32>, vector<8x128xf32> -> vector<8x128xf32>
      %c0_79 = arith.constant 0 : index
      %c0_80 = arith.constant 0 : index
      %173 = vector.load %arg5[%c0_79, %c0_80] : memref<1x128xf32, #tpu.memory_space<vmem>>, vector<1x128xf32>
      %174 = vector.broadcast %173 : vector<1x128xf32> to vector<8x128xf32>
      %175 = arith.addf %172, %174 : vector<8x128xf32>
      %c0_81 = arith.constant 0 : index
      %c0_82 = arith.constant 0 : index
      %176 = vector.load %arg6[%c0_81, %c0_82] : memref<8x128xf32, #tpu.memory_space<vmem>>, vector<8x128xf32>
      tpu.vector_store %arg6[%c0_81, %c0_82], %175 {strides = array<i32>} : memref<8x128xf32, #tpu.memory_space<vmem>>, vector<8x128xf32>,
    } else {
    }
    return
  }
  func.func @transform_0(%arg0: i32, %arg1: i32) -> (i32, i32, i32) {
    %c0_i32 = arith.constant 0 : i32
    %c0_i32_0 = arith.constant 0 : i32
    return %arg1, %arg0, %c0_i32 : i32, i32, i32
  }
  func.func @transform_1(%arg0: i32, %arg1: i32) -> (i32, i32) {
    %c0_i32 = arith.constant 0 : i32
    %c0_i32_0 = arith.constant 0 : i32
    %c0_i32_1 = arith.constant 0 : i32
    return %c0_i32, %c0_i32_0 : i32, i32
  }
  func.func @transform_2(%arg0: i32, %arg1: i32) -> (i32, i32) {
    %c0_i32 = arith.constant 0 : i32
    %c0_i32_0 = arith.constant 0 : i32
    %c0_i32_1 = arith.constant 0 : i32
    return %c0_i32, %c0_i32_0 : i32, i32
  }
  func.func @transform_3(%arg0: i32, %arg1: i32) -> (i32, i32) {
    %c0_i32 = arith.constant 0 : i32
    %c0_i32_0 = arith.constant 0 : i32
    %c0_i32_1 = arith.constant 0 : i32
    return %c0_i32, %c0_i32_0 : i32, i32
  }
  func.func @transform_4(%arg0: i32, %arg1: i32) -> (i32, i32) {
    %c0_i32 = arith.constant 0 : i32
    %c0_i32_0 = arith.constant 0 : i32
    return %arg0, %c0_i32 : i32, i32
  }
}

</mosaic_0001>

<bundles_post_ra>
// kernel: tpu_custom_call.1
= control target key start
LH: loop header
LB: loop body
LE: loop exit
PB: predicated region body
PF: predicated region fallthrough
CT: control target
= control target key end

     0   :  { %9 = vsyncpa [#allocation5], 0  ;;  %s1795_s0 = inlined_call_operand.hbm [shape: f32[8,8,128], index: 0, kind: input, shape index: {}]   ;;  %s1796_s1 = inlined_call_operand.hbm [shape: f32[128,128], index: 1, kind: input, shape index: {}]   ;;  %s1797_s2 = inlined_call_operand.hbm [shape: f32[128,128], index: 2, kind: input, shape index: {}]   ;;  %s1798_s3 = inlined_call_operand.vmem [shape: f32[1,128], index: 3, kind: input, shape index: {}]   ;;  %s1799_s4 = inlined_call_operand.hbm [shape: f32[8,128], index: 4, kind: output, shape index: {}]  }
   0x1   :  { %10 = vsyncpa [#allocation8], 0 }
   0x2   :  { %11 = vsyncpa [#allocation6], 0  ;;  %s1424_s15 = smov [#allocation7]   ;;  %s1425_s17 = smov [#allocation4]  }
   0x3   :  { %s29_s16 = sshll.u32 %s1424_s15, 4  ;;  %s17_s18 = sshll.u32 %s1425_s17, 4  ;;  %s30_s16 = int_to_ptr.vmem [resolvable:$true] %s29_s16  ;;  %s18_s18 = int_to_ptr.vmem [resolvable:$true] %s17_s18 }
   0x4   :  { %s1346_s19 = scalar_lea.vmem %s30_s16, 2048  ;;  %p1351_p1 = scmp.lt.s32.totalorder %s30_s16, %s30_s16 }
   0x5   :  { %p1347_p0 = scmp.ne.s32.totalorder %s30_s16, %s1346_s19  ;;  %p1352_p2 = scmp.lt.s32.totalorder %s1346_s19, %s1346_s19 }
   0x7   :  { %p1353_p3 = por %p1352_p2, %p1351_p1 }
   0x9   :  { %p1354_p4 = pnand %p1353_p3, %p1347_p0 }
   0xb   :  { %1357 = shalt.err (!%p1354_p4)
}
   0xc   :  { %s1426_s20 = smov 128   ;;  %s1427_s21 = smov 8  }
   0xd   :  { %35 = dma.hbm_to_vmem [thread:$0]  %s1796_s1, 2048, %s30_s16, [#allocation8], %s1426_s20, %s1426_s20, %s1427_s21  }
   0xe   :  { %s1366_s24 = scalar_lea.vmem %s18_s18, 1024  ;;  %p1371_p6 = scmp.lt.s32.totalorder %s18_s18, %s18_s18 }
   0xf   :  { %p1367_p5 = scmp.ne.s32.totalorder %s18_s18, %s1366_s24  ;;  %p1372_p7 = scmp.lt.s32.totalorder %s1366_s24, %s1366_s24 }
  0x11   :  { %p1373_p8 = por %p1372_p7, %p1371_p6 }
  0x13   :  { %p1374_p9 = pnand %p1373_p8, %p1367_p5 }
  0x15   :  { %1377 = shalt.err (!%p1374_p9)
}
  0x16   :  { %23 = dma.hbm_to_vmem [thread:$0]  %s1795_s0, 1024, %s18_s18, [#allocation5], %s1426_s20, %s1426_s20, %s1427_s21  }
  0x17   :  { %s1428_s27 = smov [#allocation9]  }
  0x18   :  { %s41_s28 = sshll.u32 %s1428_s27, 4  ;;  %s42_s28 = int_to_ptr.vmem [resolvable:$true] %s41_s28 }
  0x19   :  { %s1386_s29 = scalar_lea.vmem %s42_s28, 2048  ;;  %p1391_p11 = scmp.lt.s32.totalorder %s42_s28, %s42_s28 }
  0x1a   :  { %p1387_p10 = scmp.ne.s32.totalorder %s42_s28, %s1386_s29  ;;  %p1392_p12 = scmp.lt.s32.totalorder %s1386_s29, %s1386_s29 }
  0x1c   :  { %p1393_p13 = por %p1392_p12, %p1391_p11 }
  0x1e   :  { %p1394_p0 = pnand %p1393_p13, %p1387_p10 }
  0x20   :  { %1397 = shalt.err (!%p1394_p0)
}
  0x21   :  { %47 = dma.hbm_to_vmem [thread:$0]  %s1797_s2, 2048, %s42_s28, [#allocation8], %s1426_s20, %s1426_s20, %s1427_s21  }
  0x22   :  { %1418 = dma.done.wait [#allocation5], 1024  }
  0x23   :  { %1419 = vsyncadd [#allocation5], 4294966272 }
  0x24   :  { %1420 = dma.done.wait [#allocation8], 4096  }
  0x25   :  { %1421 = vsyncadd [#allocation8], 4294963200  ;;  %v1429_v0 = vmov 0.0   ;;  %vm1430_vm0 = vmmov 0   ;;  %v1472_v1 = vld [vmem:[#allocation7 + $0x78] sm:$0xff]  ;;  %v1474_v2 = vld [vmem:[#allocation7 + $0x70] sm:$0xff] }
  0x26   :  { %999 = vmatprep.subr.mxu0 %v1429_v0  ;;  %1031 = vmatprep.mubr.msk.f32.mxu0 %vm1430_vm0, %v1429_v0  ;;  %v1479_v3 = vld [vmem:[#allocation7 + $0x68] sm:$0xff]  ;;  %v1485_v4 = vld [vmem:[#allocation7 + $0x60] sm:$0xff]  ;;  %v1491_v5 = vld [vmem:[#allocation7 + $0x58] sm:$0xff]  ;;  %s1431_s5 = smov [#allocation10]  }
  0x27   :  { %1034 = vmatprep.subr.mxu1 %v1429_v0  ;;  %1066 = vmatprep.mubr.msk.f32.mxu1 %vm1430_vm0, %v1429_v0  ;;  %v1497_v6 = vld [vmem:[#allocation7 + $0x50] sm:$0xff]  ;;  %v1503_v7 = vld [vmem:[#allocation7 + $0x48] sm:$0xff]  ;;  %v1509_v8 = vld [vmem:[#allocation7 + $0x40] sm:$0xff]  ;;  %s835_s6 = sshll.u32 %s1431_s5, 4  ;;  %s836_s6 = int_to_ptr.vmem [resolvable:$true] %s835_s6 }
  0x28   :  { %1000 = vmatpush3.msra.mxu0 %v1472_v1  ;;  %1035 = vmatpush3.msra.mxu1 %v1472_v1  ;;  %v1515_v9 = vld [vmem:[#allocation7 + $0x38] sm:$0xff]  ;;  %v1521_v10 = vld [vmem:[#allocation7 + $0x30] sm:$0xff]  ;;  %v1527_v11 = vld [vmem:[#allocation7 + $0x28] sm:$0xff]  ;;  %s1398_s7 = scalar_lea.vmem %s836_s6, 128  ;;  %p1403_p2 = scmp.lt.s32.totalorder %s836_s6, %s836_s6 }
  0x29   :  { %1001 = vmatprep.subr.mxu0 %v1429_v0  ;;  %1036 = vmatprep.subr.mxu1 %v1429_v0  ;;  %v1533_v12 = vld [vmem:[#allocation7 + $0x20] sm:$0xff]  ;;  %v1539_v13 = vld [vmem:[#allocation7 + $0x18] sm:$0xff]  ;;  %v1545_v14 = vld [vmem:[#allocation7 + $0x10] sm:$0xff]  ;;  %p1399_p1 = scmp.ne.s32.totalorder %s836_s6, %s1398_s7  ;;  %p1404_p3 = scmp.lt.s32.totalorder %s1398_s7, %s1398_s7 }
  0x2a   :  { %1002 = vmatpush3.msra.mxu0 %v1474_v2  ;;  %1037 = vmatpush3.msra.mxu1 %v1474_v2  ;;  %v1551_v15 = vld [vmem:[#allocation7 + $0x8] sm:$0xff]  ;;  %v1557_v16 = vld [vmem:[#allocation7] sm:$0xff]  ;;  %v245_v34 = vld [vmem:[#allocation4 + $0x10] sm:$0xff] }
  0x2b   :  { %1003 = vmatprep.subr.mxu0 %v1429_v0  ;;  %1038 = vmatprep.subr.mxu1 %v1429_v0  ;;  %v83_v17 = vld [vmem:[#allocation4] sm:$0xff]  ;;  %v164_v23 = vld [vmem:[#allocation4 + $0x8] sm:$0xff]  ;;  %v326_v46 = vld [vmem:[#allocation4 + $0x18] sm:$0xff]  ;;  %p1405_p4 = por %p1404_p3, %p1403_p2 }
  0x2c   :  { %1004 = vmatpush3.msra.mxu0 %v1479_v3  ;;  %1039 = vmatpush3.msra.mxu1 %v1479_v3  ;;  %v407_v58 = vld [vmem:[#allocation4 + $0x20] sm:$0xff] }
  0x2d   :  { %1005 = vmatprep.subr.mxu0 %v1429_v0  ;;  %1040 = vmatprep.subr.mxu1 %v1429_v0  ;;  %p1406_p5 = pnand %p1405_p4, %p1399_p1 }
  0x2e   :  { %1006 = vmatpush3.msra.mxu0 %v1485_v4  ;;  %1041 = vmatpush3.msra.mxu1 %v1485_v4 }
  0x2f   :  { %1007 = vmatprep.subr.mxu0 %v1429_v0  ;;  %1042 = vmatprep.subr.mxu1 %v1429_v0 }
  0x30   :  { %1008 = vmatpush3.msra.mxu0 %v1491_v5  ;;  %1043 = vmatpush3.msra.mxu1 %v1491_v5 }
  0x31   :  { %1009 = vmatprep.subr.mxu0 %v1429_v0  ;;  %1044 = vmatprep.subr.mxu1 %v1429_v0 }
  0x32   :  { %1010 = vmatpush3.msra.mxu0 %v1497_v6  ;;  %1045 = vmatpush3.msra.mxu1 %v1497_v6 }
  0x33   :  { %1011 = vmatprep.subr.mxu0 %v1429_v0  ;;  %1046 = vmatprep.subr.mxu1 %v1429_v0 }
  0x34   :  { %1012 = vmatpush3.msra.mxu0 %v1503_v7  ;;  %1047 = vmatpush3.msra.mxu1 %v1503_v7 }
  0x35   :  { %1013 = vmatprep.subr.mxu0 %v1429_v0  ;;  %1048 = vmatprep.subr.mxu1 %v1429_v0 }
  0x36   :  { %1014 = vmatpush3.msra.mxu0 %v1509_v8  ;;  %1049 = vmatpush3.msra.mxu1 %v1509_v8 }
  0x37   :  { %1015 = vmatprep.subr.mxu0 %v1429_v0  ;;  %1050 = vmatprep.subr.mxu1 %v1429_v0 }
  0x38   :  { %1016 = vmatpush3.msra.mxu0 %v1515_v9  ;;  %1051 = vmatpush3.msra.mxu1 %v1515_v9 }
  0x39   :  { %1017 = vmatprep.subr.mxu0 %v1429_v0  ;;  %1052 = vmatprep.subr.mxu1 %v1429_v0 }
  0x3a   :  { %1018 = vmatpush3.msra.mxu0 %v1521_v10  ;;  %1053 = vmatpush3.msra.mxu1 %v1521_v10 }
  0x3b   :  { %1019 = vmatprep.subr.mxu0 %v1429_v0  ;;  %1054 = vmatprep.subr.mxu1 %v1429_v0 }
  0x3c   :  { %1020 = vmatpush3.msra.mxu0 %v1527_v11  ;;  %1055 = vmatpush3.msra.mxu1 %v1527_v11 }
  0x3d   :  { %1021 = vmatprep.subr.mxu0 %v1429_v0  ;;  %1056 = vmatprep.subr.mxu1 %v1429_v0 }
  0x3e   :  { %1022 = vmatpush3.msra.mxu0 %v1533_v12  ;;  %1057 = vmatpush3.msra.mxu1 %v1533_v12 }
  0x3f   :  { %1023 = vmatprep.subr.mxu0 %v1429_v0  ;;  %1058 = vmatprep.subr.mxu1 %v1429_v0 }
  0x40   :  { %1024 = vmatpush3.msra.mxu0 %v1539_v13  ;;  %1059 = vmatpush3.msra.mxu1 %v1539_v13 }
  0x41   :  { %1025 = vmatprep.subr.mxu0 %v1429_v0  ;;  %1060 = vmatprep.subr.mxu1 %v1429_v0 }
  0x42   :  { %1026 = vmatpush3.msra.mxu0 %v1545_v14  ;;  %1061 = vmatpush3.msra.mxu1 %v1545_v14 }
  0x43   :  { %1027 = vmatprep.subr.mxu0 %v1429_v0  ;;  %1062 = vmatprep.subr.mxu1 %v1429_v0 }
  0x44   :  { %1028 = vmatpush3.msra.mxu0 %v1551_v15  ;;  %1063 = vmatpush3.msra.mxu1 %v1551_v15 }
  0x45   :  { %1029 = vmatprep.subr.mxu0 %v1429_v0  ;;  %1064 = vmatprep.subr.mxu1 %v1429_v0 }
  0x46   :  { %1030 = vmatpush3.msra.mxu0 %v1557_v16  ;;  %1065 = vmatpush3.msra.mxu1 %v1557_v16 }
  0x47   :  { %1032 = vmatmul.mubr.f32.vlgmr.msra.gmra.mxu0 %v1429_v0  ;;  %1069 = vmatprep.subr.mxu0 %v1429_v0 }
  0x48   :  { %1070 = vmatpush3.msra.mxu0 %v1472_v1  ;;  %1101 = vmatprep.mubr.msk.f32.mxu0 %vm1430_vm0, %v1429_v0 }
  0x49   :  { %1071 = vmatprep.subr.mxu0 %v1429_v0  ;;  %1104 = vmatprep.subr.mxu1 %v1429_v0 }
  0x4a   :  { %1072 = vmatpush3.msra.mxu0 %v1474_v2 }
  0x4b   :  { %1073 = vmatprep.subr.mxu0 %v1429_v0 }
  0x4c   :  { %1074 = vmatpush3.msra.mxu0 %v1479_v3 }
  0x4d   :  { %1075 = vmatprep.subr.mxu0 %v1429_v0 }
  0x4e   :  { %1076 = vmatpush3.msra.mxu0 %v1485_v4 }
  0x4f   :  { %1077 = vmatprep.subr.mxu0 %v1429_v0 }
  0x50   :  { %1078 = vmatpush3.msra.mxu0 %v1491_v5 }
  0x51   :  { %1079 = vmatprep.subr.mxu0 %v1429_v0 }
  0x52   :  { %1080 = vmatpush3.msra.mxu0 %v1497_v6 }
  0x53   :  { %1081 = vmatprep.subr.mxu0 %v1429_v0 }
  0x54   :  { %1082 = vmatpush3.msra.mxu0 %v1503_v7 }
  0x55   :  { %1083 = vmatprep.subr.mxu0 %v1429_v0 }
  0x56   :  { %1084 = vmatpush3.msra.mxu0 %v1509_v8 }
  0x57   :  { %1085 = vmatprep.subr.mxu0 %v1429_v0 }
  0x58   :  { %1086 = vmatpush3.msra.mxu0 %v1515_v9 }
  0x59   :  { %1087 = vmatprep.subr.mxu0 %v1429_v0 }
  0x5a   :  { %1088 = vmatpush3.msra.mxu0 %v1521_v10 }
  0x5b   :  { %1089 = vmatprep.subr.mxu0 %v1429_v0 }
  0x5c   :  { %1090 = vmatpush3.msra.mxu0 %v1527_v11 }
  0x5d   :  { %1091 = vmatprep.subr.mxu0 %v1429_v0 }
  0x5e   :  { %1092 = vmatpush3.msra.mxu0 %v1533_v12 }
  0x5f   :  { %1093 = vmatprep.subr.mxu0 %v1429_v0 }
  0x60   :  { %1094 = vmatpush3.msra.mxu0 %v1539_v13 }
  0x61   :  { %1095 = vmatprep.subr.mxu0 %v1429_v0 }
  0x62   :  { %1096 = vmatpush3.msra.mxu0 %v1545_v14 }
  0x63   :  { %1097 = vmatprep.subr.mxu0 %v1429_v0 }
  0x64   :  { %1098 = vmatpush3.msra.mxu0 %v1551_v15 }
  0x65   :  { %1099 = vmatprep.subr.mxu0 %v1429_v0 }
  0x66   :  { %1100 = vmatpush3.msra.mxu0 %v1557_v16 }
  0x67   :  { %1139 = vmatprep.subr.mxu0 %v1429_v0 }
 0x107   :  { %v150_v18 = vpop.f32.mrf.mxu0 }
 0x108   :  { %v154_v19 = vadd.f32 %v150_v18, %v83_v17 }
 0x109   :  { %v1033_v20 = vpop.f32.mrf.mxu0 }
 0x10a   :  { %1322 = vtanh.f32 %v154_v19 }
 0x117   :  { %v1323_v21 = vpop.eup %1322 }
 0x118   :  { %v159_v22 = vmul.f32 0.1, %v1323_v21 }
 0x11a   :  { %1067 = vmatmul.mubr.f32.vlgmr.msra.gmra.mxu1 %v159_v22  ;;  %v161_v27 = vmul.f32 0.1, %v159_v22  ;;  %v238_v30 = vmul.f32 0.2, %v159_v22 }
 0x11b   :  { %1105 = vmatpush3.msra.mxu1 %v1472_v1  ;;  %1136 = vmatprep.mubr.msk.f32.mxu1 %vm1430_vm0, %v1429_v0 }
 0x11c   :  { %1106 = vmatprep.subr.mxu1 %v1429_v0 }
 0x11d   :  { %1107 = vmatpush3.msra.mxu1 %v1474_v2 }
 0x11e   :  { %1108 = vmatprep.subr.mxu1 %v1429_v0 }
 0x11f   :  { %1109 = vmatpush3.msra.mxu1 %v1479_v3 }
 0x120   :  { %1110 = vmatprep.subr.mxu1 %v1429_v0 }
 0x121   :  { %1111 = vmatpush3.msra.mxu1 %v1485_v4 }
 0x122   :  { %1112 = vmatprep.subr.mxu1 %v1429_v0 }
 0x123   :  { %1113 = vmatpush3.msra.mxu1 %v1491_v5 }
 0x124   :  { %1114 = vmatprep.subr.mxu1 %v1429_v0 }
 0x125   :  { %1115 = vmatpush3.msra.mxu1 %v1497_v6 }
 0x126   :  { %1116 = vmatprep.subr.mxu1 %v1429_v0 }
 0x127   :  { %1117 = vmatpush3.msra.mxu1 %v1503_v7 }
 0x128   :  { %1118 = vmatprep.subr.mxu1 %v1429_v0 }
 0x129   :  { %1119 = vmatpush3.msra.mxu1 %v1509_v8 }
 0x12a   :  { %1120 = vmatprep.subr.mxu1 %v1429_v0 }
 0x12b   :  { %1121 = vmatpush3.msra.mxu1 %v1515_v9 }
 0x12c   :  { %1122 = vmatprep.subr.mxu1 %v1429_v0 }
 0x12d   :  { %1123 = vmatpush3.msra.mxu1 %v1521_v10 }
 0x12e   :  { %1124 = vmatprep.subr.mxu1 %v1429_v0 }
 0x12f   :  { %1125 = vmatpush3.msra.mxu1 %v1527_v11 }
 0x130   :  { %1126 = vmatprep.subr.mxu1 %v1429_v0 }
 0x131   :  { %1127 = vmatpush3.msra.mxu1 %v1533_v12 }
 0x132   :  { %1128 = vmatprep.subr.mxu1 %v1429_v0 }
 0x133   :  { %1129 = vmatpush3.msra.mxu1 %v1539_v13 }
 0x134   :  { %1130 = vmatprep.subr.mxu1 %v1429_v0 }
 0x135   :  { %1131 = vmatpush3.msra.mxu1 %v1545_v14 }
 0x136   :  { %1132 = vmatprep.subr.mxu1 %v1429_v0 }
 0x137   :  { %1133 = vmatpush3.msra.mxu1 %v1551_v15 }
 0x138   :  { %1134 = vmatprep.subr.mxu1 %v1429_v0 }
 0x139   :  { %1135 = vmatpush3.msra.mxu1 %v1557_v16 }
 0x13a   :  { %1174 = vmatprep.subr.mxu1 %v1429_v0 }
 0x1da   :  { %v231_v24 = vpop.f32.mrf.mxu1 }
 0x1db   :  { %v235_v25 = vadd.f32 %v231_v24, %v164_v23 }
 0x1dc   :  { %v1068_v26 = vpop.f32.mrf.mxu1 }
 0x1dd   :  { %1324 = vtanh.f32 %v235_v25 }
 0x1ea   :  { %v1325_v28 = vpop.eup %1324 }
 0x1eb   :  { %v237_v29 = vsub.f32 %v1325_v28, %v161_v27 }
 0x1ed   :  { %v239_v31 = vsub.f32 %v237_v29, %v238_v30 }
 0x1ef   :  { %v240_v32 = vmul.f32 0.1, %v239_v31 }
 0x1f1   :  { %v241_v33 = vadd.f32 %v240_v32, %v159_v22  ;;  %v749_v32 = vld [vmem:[#allocation9 + $0x70] sm:$0xff] }
 0x1f3   :  { %1102 = vmatmul.mubr.f32.vlgmr.msra.gmra.mxu0 %v241_v33  ;;  %v242_v38 = vmul.f32 0.1, %v241_v33  ;;  %v319_v42 = vmul.f32 0.2, %v241_v33 }
 0x1f4   :  { %1140 = vmatpush3.msra.mxu0 %v1472_v1  ;;  %1171 = vmatprep.mubr.msk.f32.mxu0 %vm1430_vm0, %v1429_v0 }
 0x1f5   :  { %1141 = vmatprep.subr.mxu0 %v1429_v0  ;;  %v243_v39 = vadd.f32 %v242_v38, %v161_v27  ;;  %v743_v38 = vld [vmem:[#allocation9 + $0x40] sm:$0xff] }
 0x1f6   :  { %1142 = vmatpush3.msra.mxu0 %v1474_v2 }
 0x1f7   :  { %1143 = vmatprep.subr.mxu0 %v1429_v0 }
 0x1f8   :  { %1144 = vmatpush3.msra.mxu0 %v1479_v3 }
 0x1f9   :  { %1145 = vmatprep.subr.mxu0 %v1429_v0 }
 0x1fa   :  { %1146 = vmatpush3.msra.mxu0 %v1485_v4 }
 0x1fb   :  { %1147 = vmatprep.subr.mxu0 %v1429_v0 }
 0x1fc   :  { %1148 = vmatpush3.msra.mxu0 %v1491_v5 }
 0x1fd   :  { %1149 = vmatprep.subr.mxu0 %v1429_v0 }
 0x1fe   :  { %1150 = vmatpush3.msra.mxu0 %v1497_v6 }
 0x1ff   :  { %1151 = vmatprep.subr.mxu0 %v1429_v0 }
 0x200   :  { %1152 = vmatpush3.msra.mxu0 %v1503_v7 }
 0x201   :  { %1153 = vmatprep.subr.mxu0 %v1429_v0 }
 0x202   :  { %1154 = vmatpush3.msra.mxu0 %v1509_v8 }
 0x203   :  { %1155 = vmatprep.subr.mxu0 %v1429_v0 }
 0x204   :  { %1156 = vmatpush3.msra.mxu0 %v1515_v9 }
 0x205   :  { %1157 = vmatprep.subr.mxu0 %v1429_v0 }
 0x206   :  { %1158 = vmatpush3.msra.mxu0 %v1521_v10 }
 0x207   :  { %1159 = vmatprep.subr.mxu0 %v1429_v0 }
 0x208   :  { %1160 = vmatpush3.msra.mxu0 %v1527_v11 }
 0x209   :  { %1161 = vmatprep.subr.mxu0 %v1429_v0 }
 0x20a   :  { %1162 = vmatpush3.msra.mxu0 %v1533_v12 }
 0x20b   :  { %1163 = vmatprep.subr.mxu0 %v1429_v0 }
 0x20c   :  { %1164 = vmatpush3.msra.mxu0 %v1539_v13 }
 0x20d   :  { %1165 = vmatprep.subr.mxu0 %v1429_v0 }
 0x20e   :  { %1166 = vmatpush3.msra.mxu0 %v1545_v14 }
 0x20f   :  { %1167 = vmatprep.subr.mxu0 %v1429_v0 }
 0x210   :  { %1168 = vmatpush3.msra.mxu0 %v1551_v15 }
 0x211   :  { %1169 = vmatprep.subr.mxu0 %v1429_v0 }
 0x212   :  { %1170 = vmatpush3.msra.mxu0 %v1557_v16 }
 0x213   :  { %1209 = vmatprep.subr.mxu0 %v1429_v0 }
 0x2b3   :  { %v312_v35 = vpop.f32.mrf.mxu0 }
 0x2b4   :  { %v316_v36 = vadd.f32 %v312_v35, %v245_v34  ;;  %v747_v34 = vld [vmem:[#allocation9 + $0x60] sm:$0xff]  ;;  %v746_v35 = vld [vmem:[#allocation9 + $0x58] sm:$0xff] }
 0x2b5   :  { %v1103_v37 = vpop.f32.mrf.mxu0 }
 0x2b6   :  { %1326 = vtanh.f32 %v316_v36  ;;  %v745_v36 = vld [vmem:[#allocation9 + $0x50] sm:$0xff]  ;;  %v744_v37 = vld [vmem:[#allocation9 + $0x48] sm:$0xff] }
 0x2c3   :  { %v1327_v40 = vpop.eup %1326 }
 0x2c4   :  { %v318_v41 = vsub.f32 %v1327_v40, %v243_v39  ;;  %v741_v40 = vld [vmem:[#allocation9 + $0x30] sm:$0xff] }
 0x2c6   :  { %v320_v43 = vsub.f32 %v318_v41, %v319_v42  ;;  %v740_v41 = vld [vmem:[#allocation9 + $0x28] sm:$0xff]  ;;  %v739_v42 = vld [vmem:[#allocation9 + $0x20] sm:$0xff] }
 0x2c8   :  { %v321_v44 = vmul.f32 0.1, %v320_v43  ;;  %v738_v43 = vld [vmem:[#allocation9 + $0x18] sm:$0xff] }
 0x2ca   :  { %v322_v45 = vadd.f32 %v321_v44, %v241_v33  ;;  %v748_v33 = vld [vmem:[#allocation9 + $0x68] sm:$0xff]  ;;  %v737_v44 = vld [vmem:[#allocation9 + $0x10] sm:$0xff] }
 0x2cc   :  { %1137 = vmatmul.mubr.f32.vlgmr.msra.gmra.mxu1 %v322_v45  ;;  %v323_v50 = vmul.f32 0.1, %v322_v45  ;;  %v400_v54 = vmul.f32 0.2, %v322_v45 }
 0x2cd   :  { %1175 = vmatpush3.msra.mxu1 %v1472_v1  ;;  %1206 = vmatprep.mubr.msk.f32.mxu1 %vm1430_vm0, %v1429_v0 }
 0x2ce   :  { %1176 = vmatprep.subr.mxu1 %v1429_v0  ;;  %v324_v51 = vadd.f32 %v323_v50, %v243_v39  ;;  %v742_v39 = vld [vmem:[#allocation9 + $0x38] sm:$0xff] }
 0x2cf   :  { %1177 = vmatpush3.msra.mxu1 %v1474_v2 }
 0x2d0   :  { %1178 = vmatprep.subr.mxu1 %v1429_v0 }
 0x2d1   :  { %1179 = vmatpush3.msra.mxu1 %v1479_v3 }
 0x2d2   :  { %1180 = vmatprep.subr.mxu1 %v1429_v0 }
 0x2d3   :  { %1181 = vmatpush3.msra.mxu1 %v1485_v4 }
 0x2d4   :  { %1182 = vmatprep.subr.mxu1 %v1429_v0 }
 0x2d5   :  { %1183 = vmatpush3.msra.mxu1 %v1491_v5 }
 0x2d6   :  { %1184 = vmatprep.subr.mxu1 %v1429_v0 }
 0x2d7   :  { %1185 = vmatpush3.msra.mxu1 %v1497_v6 }
 0x2d8   :  { %1186 = vmatprep.subr.mxu1 %v1429_v0 }
 0x2d9   :  { %1187 = vmatpush3.msra.mxu1 %v1503_v7 }
 0x2da   :  { %1188 = vmatprep.subr.mxu1 %v1429_v0 }
 0x2db   :  { %1189 = vmatpush3.msra.mxu1 %v1509_v8 }
 0x2dc   :  { %1190 = vmatprep.subr.mxu1 %v1429_v0 }
 0x2dd   :  { %1191 = vmatpush3.msra.mxu1 %v1515_v9 }
 0x2de   :  { %1192 = vmatprep.subr.mxu1 %v1429_v0 }
 0x2df   :  { %1193 = vmatpush3.msra.mxu1 %v1521_v10 }
 0x2e0   :  { %1194 = vmatprep.subr.mxu1 %v1429_v0 }
 0x2e1   :  { %1195 = vmatpush3.msra.mxu1 %v1527_v11 }
 0x2e2   :  { %1196 = vmatprep.subr.mxu1 %v1429_v0 }
 0x2e3   :  { %1197 = vmatpush3.msra.mxu1 %v1533_v12 }
 0x2e4   :  { %1198 = vmatprep.subr.mxu1 %v1429_v0 }
 0x2e5   :  { %1199 = vmatpush3.msra.mxu1 %v1539_v13 }
 0x2e6   :  { %1200 = vmatprep.subr.mxu1 %v1429_v0 }
 0x2e7   :  { %1201 = vmatpush3.msra.mxu1 %v1545_v14 }
 0x2e8   :  { %1202 = vmatprep.subr.mxu1 %v1429_v0 }
 0x2e9   :  { %1203 = vmatpush3.msra.mxu1 %v1551_v15 }
 0x2ea   :  { %1204 = vmatprep.subr.mxu1 %v1429_v0 }
 0x2eb   :  { %1205 = vmatpush3.msra.mxu1 %v1557_v16 }
 0x2ec   :  { %1244 = vmatprep.subr.mxu1 %v1429_v0 }
 0x38c   :  { %v393_v47 = vpop.f32.mrf.mxu1 }
 0x38d   :  { %v397_v48 = vadd.f32 %v393_v47, %v326_v46  ;;  %v735_v46 = vld [vmem:[#allocation9] sm:$0xff]  ;;  %v650_v47 = vld [vmem:[#allocation4 + $0x38] sm:$0xff] }
 0x38e   :  { %v1138_v49 = vpop.f32.mrf.mxu1 }
 0x38f   :  { %1328 = vtanh.f32 %v397_v48 }
 0x39c   :  { %v1329_v52 = vpop.eup %1328 }
 0x39d   :  { %v399_v53 = vsub.f32 %v1329_v52, %v324_v51 }
 0x39f   :  { %v401_v55 = vsub.f32 %v399_v53, %v400_v54 }
 0x3a1   :  { %v402_v56 = vmul.f32 0.1, %v401_v55 }
 0x3a3   :  { %v403_v57 = vadd.f32 %v402_v56, %v322_v45  ;;  %v736_v45 = vld [vmem:[#allocation9 + $0x8] sm:$0xff] }
 0x3a5   :  { %1172 = vmatmul.mubr.f32.vlgmr.msra.gmra.mxu0 %v403_v57  ;;  %v404_v62 = vmul.f32 0.1, %v403_v57  ;;  %v481_v19 = vmul.f32 0.2, %v403_v57 }
 0x3a6   :  { %1210 = vmatpush3.msra.mxu0 %v1472_v1  ;;  %1241 = vmatprep.mubr.msk.f32.mxu0 %vm1430_vm0, %v1429_v0 }
 0x3a7   :  { %1211 = vmatprep.subr.mxu0 %v1429_v0  ;;  %v405_v63 = vadd.f32 %v404_v62, %v324_v51 }
 0x3a8   :  { %1212 = vmatpush3.msra.mxu0 %v1474_v2 }
 0x3a9   :  { %1213 = vmatprep.subr.mxu0 %v1429_v0 }
 0x3aa   :  { %1214 = vmatpush3.msra.mxu0 %v1479_v3 }
 0x3ab   :  { %1215 = vmatprep.subr.mxu0 %v1429_v0 }
 0x3ac   :  { %1216 = vmatpush3.msra.mxu0 %v1485_v4 }
 0x3ad   :  { %1217 = vmatprep.subr.mxu0 %v1429_v0 }
 0x3ae   :  { %1218 = vmatpush3.msra.mxu0 %v1491_v5 }
 0x3af   :  { %1219 = vmatprep.subr.mxu0 %v1429_v0 }
 0x3b0   :  { %1220 = vmatpush3.msra.mxu0 %v1497_v6 }
 0x3b1   :  { %1221 = vmatprep.subr.mxu0 %v1429_v0 }
 0x3b2   :  { %1222 = vmatpush3.msra.mxu0 %v1503_v7 }
 0x3b3   :  { %1223 = vmatprep.subr.mxu0 %v1429_v0 }
 0x3b4   :  { %1224 = vmatpush3.msra.mxu0 %v1509_v8 }
 0x3b5   :  { %1225 = vmatprep.subr.mxu0 %v1429_v0 }
 0x3b6   :  { %1226 = vmatpush3.msra.mxu0 %v1515_v9 }
 0x3b7   :  { %1227 = vmatprep.subr.mxu0 %v1429_v0 }
 0x3b8   :  { %1228 = vmatpush3.msra.mxu0 %v1521_v10 }
 0x3b9   :  { %1229 = vmatprep.subr.mxu0 %v1429_v0 }
 0x3ba   :  { %1230 = vmatpush3.msra.mxu0 %v1527_v11 }
 0x3bb   :  { %1231 = vmatprep.subr.mxu0 %v1429_v0 }
 0x3bc   :  { %1232 = vmatpush3.msra.mxu0 %v1533_v12 }
 0x3bd   :  { %1233 = vmatprep.subr.mxu0 %v1429_v0 }
 0x3be   :  { %1234 = vmatpush3.msra.mxu0 %v1539_v13 }
 0x3bf   :  { %1235 = vmatprep.subr.mxu0 %v1429_v0 }
 0x3c0   :  { %1236 = vmatpush3.msra.mxu0 %v1545_v14 }
 0x3c1   :  { %1237 = vmatprep.subr.mxu0 %v1429_v0 }
 0x3c2   :  { %1238 = vmatpush3.msra.mxu0 %v1551_v15 }
 0x3c3   :  { %1239 = vmatprep.subr.mxu0 %v1429_v0 }
 0x3c4   :  { %1240 = vmatpush3.msra.mxu0 %v1557_v16 }
 0x3c5   :  { %1279 = vmatprep.subr.mxu0 %v1429_v0 }
 0x465   :  { %v474_v59 = vpop.f32.mrf.mxu0 }
 0x466   :  { %v478_v60 = vadd.f32 %v474_v59, %v407_v58 }
 0x467   :  { %v1173_v61 = vpop.f32.mrf.mxu0 }
 0x468   :  { %1330 = vtanh.f32 %v478_v60 }
 0x475   :  { %v1331_v17 = vpop.eup %1330 }
 0x476   :  { %v480_v18 = vsub.f32 %v1331_v17, %v405_v63 }
 0x478   :  { %v482_v20 = vsub.f32 %v480_v18, %v481_v19 }
 0x47a   :  { %v483_v21 = vmul.f32 0.1, %v482_v20 }
 0x47c   :  { %v484_v22 = vadd.f32 %v483_v21, %v403_v57 }
 0x47e   :  { %1207 = vmatmul.mubr.f32.vlgmr.msra.gmra.mxu1 %v484_v22 }
 0x47f   :  { %1245 = vmatpush3.msra.mxu1 %v1472_v1  ;;  %1276 = vmatprep.mubr.msk.f32.mxu1 %vm1430_vm0, %v1429_v0  ;;  %v488_v1 = vld [vmem:[#allocation4 + $0x28] sm:$0xff] }
 0x480   :  { %1246 = vmatprep.subr.mxu1 %v1429_v0 }
 0x481   :  { %1247 = vmatpush3.msra.mxu1 %v1474_v2 }
 0x482   :  { %1248 = vmatprep.subr.mxu1 %v1429_v0 }
 0x483   :  { %1249 = vmatpush3.msra.mxu1 %v1479_v3 }
 0x484   :  { %1250 = vmatprep.subr.mxu1 %v1429_v0 }
 0x485   :  { %1251 = vmatpush3.msra.mxu1 %v1485_v4 }
 0x486   :  { %1252 = vmatprep.subr.mxu1 %v1429_v0 }
 0x487   :  { %1253 = vmatpush3.msra.mxu1 %v1491_v5  ;;  %v485_v5 = vmul.f32 0.1, %v484_v22 }
 0x488   :  { %1254 = vmatprep.subr.mxu1 %v1429_v0 }
 0x489   :  { %1255 = vmatpush3.msra.mxu1 %v1497_v6  ;;  %v486_v6 = vadd.f32 %v485_v5, %v405_v63 }
 0x48a   :  { %1256 = vmatprep.subr.mxu1 %v1429_v0 }
 0x48b   :  { %1257 = vmatpush3.msra.mxu1 %v1503_v7 }
 0x48c   :  { %1258 = vmatprep.subr.mxu1 %v1429_v0 }
 0x48d   :  { %1259 = vmatpush3.msra.mxu1 %v1509_v8 }
 0x48e   :  { %1260 = vmatprep.subr.mxu1 %v1429_v0 }
 0x48f   :  { %1261 = vmatpush3.msra.mxu1 %v1515_v9  ;;  %v562_v9 = vmul.f32 0.2, %v484_v22 }
 0x490   :  { %1262 = vmatprep.subr.mxu1 %v1429_v0 }
 0x491   :  { %1263 = vmatpush3.msra.mxu1 %v1521_v10 }
 0x492   :  { %1264 = vmatprep.subr.mxu1 %v1429_v0 }
 0x493   :  { %1265 = vmatpush3.msra.mxu1 %v1527_v11 }
 0x494   :  { %1266 = vmatprep.subr.mxu1 %v1429_v0 }
 0x495   :  { %1267 = vmatpush3.msra.mxu1 %v1533_v12 }
 0x496   :  { %1268 = vmatprep.subr.mxu1 %v1429_v0 }
 0x497   :  { %1269 = vmatpush3.msra.mxu1 %v1539_v13  ;;  %v750_v13 = vld [vmem:[#allocation9 + $0x78] sm:$0xff] }
 0x498   :  { %1270 = vmatprep.subr.mxu1 %v1429_v0 }
 0x499   :  { %1271 = vmatpush3.msra.mxu1 %v1545_v14  ;;  %v569_v14 = vld [vmem:[#allocation4 + $0x30] sm:$0xff] }
 0x49a   :  { %1272 = vmatprep.subr.mxu1 %v1429_v0 }
 0x49b   :  { %1273 = vmatpush3.msra.mxu1 %v1551_v15 }
 0x49c   :  { %1274 = vmatprep.subr.mxu1 %v1429_v0 }
 0x49d   :  { %1275 = vmatpush3.msra.mxu1 %v1557_v16 }
 0x53e   :  { %v555_v2 = vpop.f32.mrf.mxu1 }
 0x53f   :  { %v559_v3 = vadd.f32 %v555_v2, %v488_v1 }
 0x540   :  { %v1208_v4 = vpop.f32.mrf.mxu1 }
 0x541   :  { %1332 = vtanh.f32 %v559_v3 }
 0x54e   :  { %v1333_v7 = vpop.eup %1332 }
 0x54f   :  { %v561_v8 = vsub.f32 %v1333_v7, %v486_v6 }
 0x551   :  { %v563_v10 = vsub.f32 %v561_v8, %v562_v9 }
 0x553   :  { %v564_v11 = vmul.f32 0.1, %v563_v10 }
 0x555   :  { %v565_v12 = vadd.f32 %v564_v11, %v484_v22 }
 0x557   :  { %1242 = vmatmul.mubr.f32.vlgmr.msra.gmra.mxu0 %v565_v12  ;;  %v566_v24 = vmul.f32 0.1, %v565_v12  ;;  %v643_v28 = vmul.f32 0.2, %v565_v12 }
 0x558   :  { %1311 = vmatprep.mubr.msk.f32.mxu0 %vm1430_vm0, %v1429_v0  ;;  %1280 = vmatpush3.msra.mxu0 %v750_v13 }
 0x559   :  { %1281 = vmatprep.subr.mxu0 %v1429_v0  ;;  %v567_v25 = vadd.f32 %v566_v24, %v486_v6 }
 0x55a   :  { %1282 = vmatpush3.msra.mxu0 %v749_v32 }
 0x55b   :  { %1283 = vmatprep.subr.mxu0 %v1429_v0 }
 0x55c   :  { %1284 = vmatpush3.msra.mxu0 %v748_v33 }
 0x55d   :  { %1285 = vmatprep.subr.mxu0 %v1429_v0 }
 0x55e   :  { %1286 = vmatpush3.msra.mxu0 %v747_v34 }
 0x55f   :  { %1287 = vmatprep.subr.mxu0 %v1429_v0 }
 0x560   :  { %1288 = vmatpush3.msra.mxu0 %v746_v35 }
 0x561   :  { %1289 = vmatprep.subr.mxu0 %v1429_v0 }
 0x562   :  { %1290 = vmatpush3.msra.mxu0 %v745_v36 }
 0x563   :  { %1291 = vmatprep.subr.mxu0 %v1429_v0 }
 0x564   :  { %1292 = vmatpush3.msra.mxu0 %v744_v37 }
 0x565   :  { %1293 = vmatprep.subr.mxu0 %v1429_v0 }
 0x566   :  { %1294 = vmatpush3.msra.mxu0 %v743_v38 }
 0x567   :  { %1295 = vmatprep.subr.mxu0 %v1429_v0 }
 0x568   :  { %1296 = vmatpush3.msra.mxu0 %v742_v39 }
 0x569   :  { %1297 = vmatprep.subr.mxu0 %v1429_v0 }
 0x56a   :  { %1298 = vmatpush3.msra.mxu0 %v741_v40 }
 0x56b   :  { %1299 = vmatprep.subr.mxu0 %v1429_v0 }
 0x56c   :  { %1300 = vmatpush3.msra.mxu0 %v740_v41 }
 0x56d   :  { %1301 = vmatprep.subr.mxu0 %v1429_v0 }
 0x56e   :  { %1302 = vmatpush3.msra.mxu0 %v739_v42 }
 0x56f   :  { %1303 = vmatprep.subr.mxu0 %v1429_v0 }
 0x570   :  { %1304 = vmatpush3.msra.mxu0 %v738_v43 }
 0x571   :  { %1305 = vmatprep.subr.mxu0 %v1429_v0 }
 0x572   :  { %1306 = vmatpush3.msra.mxu0 %v737_v44 }
 0x573   :  { %1307 = vmatprep.subr.mxu0 %v1429_v0 }
 0x574   :  { %1308 = vmatpush3.msra.mxu0 %v736_v45 }
 0x575   :  { %1309 = vmatprep.subr.mxu0 %v1429_v0  ;;  %v845_v0 = vld [vmem:[%s1798_s3] ss:$0 sm:$0xff] }
 0x576   :  { %1310 = vmatpush3.msra.mxu0 %v735_v46 }
 0x617   :  { %v636_v15 = vpop.f32.mrf.mxu0 }
 0x618   :  { %v640_v16 = vadd.f32 %v636_v15, %v569_v14 }
 0x619   :  { %v1243_v23 = vpop.f32.mrf.mxu0 }
 0x61a   :  { %1334 = vtanh.f32 %v640_v16 }
 0x627   :  { %v1335_v26 = vpop.eup %1334 }
 0x628   :  { %v642_v27 = vsub.f32 %v1335_v26, %v567_v25 }
 0x62a   :  { %v644_v29 = vsub.f32 %v642_v27, %v643_v28 }
 0x62c   :  { %v645_v30 = vmul.f32 0.1, %v644_v29 }
 0x62e   :  { %v646_v31 = vadd.f32 %v645_v30, %v565_v12 }
 0x630   :  { %1277 = vmatmul.mubr.f32.vlgmr.msra.gmra.mxu1 %v646_v31  ;;  %v647_v51 = vmul.f32 0.1, %v646_v31  ;;  %v724_v55 = vmul.f32 0.2, %v646_v31 }
 0x632   :  { %v648_v52 = vadd.f32 %v647_v51, %v567_v25 }
 0x6f0   :  { %v717_v48 = vpop.f32.mrf.mxu1 }
 0x6f1   :  { %v721_v49 = vadd.f32 %v717_v48, %v650_v47 }
 0x6f2   :  { %v1278_v50 = vpop.f32.mrf.mxu1 }
 0x6f3   :  { %1336 = vtanh.f32 %v721_v49 }
 0x700   :  { %v1337_v53 = vpop.eup %1336 }
 0x701   :  { %v723_v54 = vsub.f32 %v1337_v53, %v648_v52 }
 0x703   :  { %v725_v56 = vsub.f32 %v723_v54, %v724_v55 }
 0x705   :  { %v726_v57 = vmul.f32 0.1, %v725_v56 }
 0x707   :  { %v727_v58 = vadd.f32 %v726_v57, %v646_v31 }
 0x709   :  { %v728_v59 = vmul.f32 0.1, %v727_v58 }
 0x70b   :  { %v729_v60 = vadd.f32 %v728_v59, %v648_v52 }
 0x70d   :  { %1312 = vmatmul.mubr.f32.vlgmr.msra.gmra.mxu0 %v729_v60 }
 0x7cd   :  { %v824_v61 = vpop.f32.mrf.mxu0 }
 0x7ce   :  { %v825_v62 = vadd.f32 %v845_v0, %v824_v61 }
 0x7cf   :  { %v1313_v63 = vpop.f32.mrf.mxu0 }
 0x7d0   :  { %828 = vst [vmem:[#allocation10] sm:$0xff] %v825_v62 }
 0x7d1   :  { %1409 = shalt.err (!%p1406_p5)
}
 0x7d2   :  { %838 = dma.vmem_to_hbm [thread:$0]  %s836_s6, 128, %s1799_s4, [#allocation6]  }
 0x7d3   :  { %1422 = dma.done.wait [#allocation6], 128  }
 0x7d4   :  { %1423 = vsyncadd [#allocation6], 4294967168 }
 0x7d5   :  { %842 = vsyncpa [#allocation5], 1 }
 0x7d6   :  { %843 = vsyncpa [#allocation8], 1 }
 0x7d7   :  { %844 = vsyncpa [#allocation6], 1 }

</bundles_post_ra>
